<compile_context>
chip_gen: v7x
topology: tpu7x:2x2x1
jax: 0.10.0
libtpu: 0.0.40
codegen_flags: <defaults>
</compile_context>

<pallas_src>
import functools

import jax
import jax.numpy as jnp
from jax import lax
from jax.experimental import pallas as pl
from jax.experimental.pallas import tpu as pltpu

LN_EPS = 1e-5  # nn.LayerNorm default


def _cdiv(a, b):
    return -(-a // b)


def _cnn_layernorm_kernel(x_ref, g_ref, b_ref, o_ref):
    # x_ref: (tile_bc, F, tile_t); g_ref / b_ref: (F, 1) -> lane/leading broadcast.
    x = x_ref[...].astype(jnp.float32)
    g = g_ref[...].astype(jnp.float32)
    b = b_ref[...].astype(jnp.float32)

    inv_f = 1.0 / x.shape[-2]                      # static Python scalar
    # Single pass: sum and sum-of-squares together (sublane reductions -> XLU).
    s1 = jnp.sum(x, axis=-2, keepdims=True)        # (tile_bc, 1, tile_t)
    s2 = jnp.sum(x * x, axis=-2, keepdims=True)
    mean = s1 * inv_f
    var = jnp.maximum(s2 * inv_f - mean * mean, 0.0)   # biased, like nn.LayerNorm
    inv = lax.rsqrt(var + LN_EPS)                      # EUP slot

    o_ref[...] = ((x - mean) * inv * g + b).astype(o_ref.dtype)


def _pick_tiles(bc, f, t, itemsize, budget_bytes):
    """Choose (tile_bc, tile_t) for blocks of shape (tile_bc, F, tile_t).

    The budget is interpreted against the fp32 compute working set (the
    kernel upcasts to f32), so sub-4-byte input dtypes don't overshoot VMEM.
    """
    elem = max(4, itemsize)

    # ---- Lane (T) axis ----------------------------------------------------
    if t <= 128 or f * t * elem <= budget_bytes:
        # Full-T blocks: each bc row is one contiguous F*T DMA run.  (T <= 128
        # has no other layout-legal choice; small-T cost is amortized by
        # batching many bc rows below.)
        tile_t = t
    else:
        # Fixed lane-dense 128-multiple tile; ragged last block handled via a
        # cdiv grid + Pallas write masking (reduction is over F, so garbage
        # lanes in the padded block never contaminate in-bounds columns).
        tile_t = (budget_bytes // (f * elem)) // 128 * 128
        tile_t = max(128, min(1024, tile_t))
    grid_t = _cdiv(t, tile_t)

    # ---- Leading (B*C) axis: pack rows up to the block budget --------------
    tile_bc = max(1, min(bc, budget_bytes // (f * tile_t * elem)))

    # ---- v7x megacore: prefer an even total step count (2 TensorCores) -----
    def nsteps(tb):
        return _cdiv(bc, tb) * grid_t

    if nsteps(tile_bc) < 2 or nsteps(tile_bc) % 2 != 0:
        fallback = None
        for tb in range(tile_bc, 0, -1):
            s = nsteps(tb)
            if s >= 2 and s % 2 == 0:
                if bc % tb == 0:          # prefer exact blocks (no ragged bc edge)
                    tile_bc = tb
                    fallback = None
                    break
                if fallback is None:
                    fallback = tb
        if fallback is not None:
            tile_bc = fallback

    return tile_bc, tile_t


@functools.partial(jax.jit, static_argnames=("block_budget_bytes",))
def cnn_layer_norm(x, gamma, beta, *, block_budget_bytes=6 * 1024 * 1024):
    """x: (B, C, F, T) with F == n_feats. Returns same shape/dtype as x."""
    B, C, F, T = x.shape
    assert F == gamma.shape[0], "dim 2 of x must equal n_feats"

    BC = B * C
    x3 = x.reshape(BC, F, T)          # contiguous merge of leading dims: free
    g2 = gamma.reshape(F, 1)
    b2 = beta.reshape(F, 1)

    tile_bc, tile_t = _pick_tiles(
        BC, F, T, jnp.dtype(x.dtype).itemsize, block_budget_bytes)
    grid = (_cdiv(BC, tile_bc), _cdiv(T, tile_t))

    out3 = pl.pallas_call(
        _cnn_layernorm_kernel,
        out_shape=jax.ShapeDtypeStruct((BC, F, T), x.dtype),
        grid_spec=pltpu.PrefetchScalarGridSpec(
            num_scalar_prefetch=0,
            grid=grid,
            in_specs=[
                pl.BlockSpec((tile_bc, F, tile_t), lambda i, j: (i, 0, j)),
                # gamma/beta: constant block index -> fetched once and kept
                # VMEM-resident across the whole grid (no per-step re-DMA).
                pl.BlockSpec((F, 1), lambda i, j: (0, 0)),
                pl.BlockSpec((F, 1), lambda i, j: (0, 0)),
            ],
            out_specs=pl.BlockSpec((tile_bc, F, tile_t), lambda i, j: (i, 0, j)),
        ),
        compiler_params=pltpu.CompilerParams(
            dimension_semantics=("parallel", "parallel"),
            # ~6 MiB f32 blocks, double-buffered in + out, plus f32 kernel
            # temporaries: stays under 48 MiB, which fits v7x's 64 MiB/TC and
            # is comfortable on v5e/v6e (128 MiB).
            vmem_limit_bytes=48 * 1024 * 1024,
        ),
    )(x3, g2, b2)

    return out3.reshape(B, C, F, T)


def _reference(x, gamma, beta):
    xt = jnp.transpose(x, (0, 1, 3, 2)).astype(jnp.float32)
    mean = jnp.mean(xt, axis=-1, keepdims=True)
    var = jnp.mean((xt - mean) ** 2, axis=-1, keepdims=True)
    y = (xt - mean) / jnp.sqrt(var + LN_EPS) * gamma.astype(jnp.float32) \
        + beta.astype(jnp.float32)
    return jnp.transpose(y, (0, 1, 3, 2)).astype(x.dtype)


if __name__ == "__main__":
    key = jax.random.PRNGKey(0)
    k1, k2, k3 = jax.random.split(key, 3)

    # --- Test 1: the module's nominal small shape (small-T path) -----------
    B, C, n_feats, T = 2, 4, 16, 16
    x = jax.random.normal(k1, (B, C, n_feats, T), dtype=jnp.float32)
    gamma = 1.0 + 0.01 * jnp.arange(n_feats, dtype=jnp.float32)
    beta = 0.02 * jnp.arange(n_feats, dtype=jnp.float32)

    out = jax.block_until_ready(cnn_layer_norm(x, gamma, beta))
    ref = _reference(x, gamma, beta)
    assert out.shape == x.shape and out.dtype == x.dtype
    assert jnp.allclose(out, ref, atol=1e-5, rtol=1e-5), "mismatch (test 1)"

    # --- Test 2: T > 128, not a multiple of 128; tiny budget forces the
    #     cdiv + ragged-last-lane-block (write-masked) path. ----------------
    B2, C2, F2, T2 = 1, 2, 8, 200
    x2 = jax.random.normal(k2, (B2, C2, F2, T2), dtype=jnp.float32)
    g2 = 1.0 + 0.05 * jnp.arange(F2, dtype=jnp.float32)
    b2 = -0.03 * jnp.arange(F2, dtype=jnp.float32)
    out2 = jax.block_until_ready(
        cnn_layer_norm(x2, g2, b2, block_budget_bytes=4096))
    ref2 = _reference(x2, g2, b2)
    assert jnp.allclose(out2, ref2, atol=1e-5, rtol=1e-5), "mismatch (test 2)"

    # --- Test 3: bf16 input (fp32-working-set budgeting + upcast path) -----
    B3, C3, F3, T3 = 2, 3, 16, 160
    x3 = jax.random.normal(k3, (B3, C3, F3, T3), dtype=jnp.bfloat16)
    g3 = 1.0 + 0.01 * jnp.arange(F3, dtype=jnp.float32)
    b3 = 0.02 * jnp.arange(F3, dtype=jnp.float32)
    out3 = jax.block_until_ready(cnn_layer_norm(x3, g3, b3))
    ref3 = _reference(x3, g3, b3)
    assert out3.dtype == jnp.bfloat16
    assert jnp.allclose(out3.astype(jnp.float32), ref3.astype(jnp.float32),
                        atol=5e-2, rtol=5e-2), "mismatch (test 3)"

    print("KERNEL_OK")
</pallas_src>

<mosaic_0001>
module attributes {stable_mosaic.version = 11 : i64} {
  func.func @_cnn_layernorm_kernel(%arg0: i32, %arg1: i32, %arg2: memref<4x16x16xf32, #tpu.memory_space<vmem>>, %arg3: memref<16x1xf32, #tpu.memory_space<vmem>>, %arg4: memref<16x1xf32, #tpu.memory_space<vmem>>, %arg5: memref<4x16x16xf32, #tpu.memory_space<vmem>>) attributes {dimension_semantics = [#tpu.dimension_semantics<parallel>, #tpu.dimension_semantics<parallel>], iteration_bounds = array<i64: 2, 1>, scalar_prefetch = 0 : i64, scratch_operands = 0 : i64, tpu.core_type = #tpu.core_type<tc>, window_params = [{transform_indices = @transform_0, window_bounds = array<i64: 4, 16, 16>}, {pipeline_mode = #tpu.pipeline_mode<synchronous>, transform_indices = @transform_1, window_bounds = array<i64: 16, 1>}, {pipeline_mode = #tpu.pipeline_mode<synchronous>, transform_indices = @transform_2, window_bounds = array<i64: 16, 1>}, {transform_indices = @transform_3, window_bounds = array<i64: 4, 16, 16>}]} {
    %c0 = arith.constant 0 : index
    %c0_0 = arith.constant 0 : index
    %c0_1 = arith.constant 0 : index
    %0 = vector.load %arg2[%c0, %c0_0, %c0_1] : memref<4x16x16xf32, #tpu.memory_space<vmem>>, vector<4x16x16xf32>
    %c0_2 = arith.constant 0 : index
    %c0_3 = arith.constant 0 : index
    %1 = vector.load %arg3[%c0_2, %c0_3] : memref<16x1xf32, #tpu.memory_space<vmem>>, vector<16x1xf32>
    %c0_4 = arith.constant 0 : index
    %c0_5 = arith.constant 0 : index
    %2 = vector.load %arg4[%c0_4, %c0_5] : memref<16x1xf32, #tpu.memory_space<vmem>>, vector<16x1xf32>
    %cst = arith.constant dense<0.000000e+00> : vector<4x16xf32>
    %3 = vector.multi_reduction <add>, %0, %cst [1] : vector<4x16x16xf32> to vector<4x16xf32>
    %4 = vector.shape_cast %3 : vector<4x16xf32> to vector<4x1x16xf32>
    %5 = arith.mulf %0, %0 : vector<4x16x16xf32>
    %cst_6 = arith.constant dense<0.000000e+00> : vector<4x16xf32>
    %6 = vector.multi_reduction <add>, %5, %cst_6 [1] : vector<4x16x16xf32> to vector<4x16xf32>
    %7 = vector.shape_cast %6 : vector<4x16xf32> to vector<4x1x16xf32>
    %cst_7 = arith.constant 6.250000e-02 : f32
    %8 = vector.broadcast %cst_7 : f32 to vector<4x1x16xf32>
    %9 = arith.mulf %4, %8 : vector<4x1x16xf32>
    %cst_8 = arith.constant 6.250000e-02 : f32
    %10 = vector.broadcast %cst_8 : f32 to vector<4x1x16xf32>
    %11 = arith.mulf %7, %10 : vector<4x1x16xf32>
    %12 = arith.mulf %9, %9 : vector<4x1x16xf32>
    %13 = arith.subf %11, %12 : vector<4x1x16xf32>
    %cst_9 = arith.constant 0.000000e+00 : f32
    %14 = vector.broadcast %cst_9 : f32 to vector<4x1x16xf32>
    %15 = arith.maximumf %13, %14 : vector<4x1x16xf32>
    %cst_10 = arith.constant 9.99999974E-6 : f32
    %16 = vector.broadcast %cst_10 : f32 to vector<4x1x16xf32>
    %17 = arith.addf %15, %16 : vector<4x1x16xf32>
    %18 = math.rsqrt %17 : vector<4x1x16xf32>
    %19 = vector.broadcast %9 : vector<4x1x16xf32> to vector<4x16x16xf32>
    %20 = arith.subf %0, %19 : vector<4x16x16xf32>
    %21 = vector.broadcast %18 : vector<4x1x16xf32> to vector<4x16x16xf32>
    %22 = arith.mulf %20, %21 : vector<4x16x16xf32>
    %23 = vector.shape_cast %1 : vector<16x1xf32> to vector<1x16x1xf32>
    %24 = vector.broadcast %23 : vector<1x16x1xf32> to vector<4x16x16xf32>
    %25 = arith.mulf %22, %24 : vector<4x16x16xf32>
    %26 = vector.shape_cast %2 : vector<16x1xf32> to vector<1x16x1xf32>
    %27 = vector.broadcast %26 : vector<1x16x1xf32> to vector<4x16x16xf32>
    %28 = arith.addf %25, %27 : vector<4x16x16xf32>
    %c0_11 = arith.constant 0 : index
    %c0_12 = arith.constant 0 : index
    %c0_13 = arith.constant 0 : index
    %29 = vector.load %arg5[%c0_11, %c0_12, %c0_13] : memref<4x16x16xf32, #tpu.memory_space<vmem>>, vector<4x16x16xf32>
    tpu.vector_store %arg5[%c0_11, %c0_12, %c0_13], %28 {strides = array<i32>} : memref<4x16x16xf32, #tpu.memory_space<vmem>>, vector<4x16x16xf32>,
    return
  }
  func.func @transform_0(%arg0: i32, %arg1: i32) -> (i32, i32, i32) {
    %c0_i32 = arith.constant 0 : i32
    %c0_i32_0 = arith.constant 0 : i32
    return %arg0, %c0_i32, %arg1 : i32, i32, i32
  }
  func.func @transform_1(%arg0: i32, %arg1: i32) -> (i32, i32) {
    %c0_i32 = arith.constant 0 : i32
    %c0_i32_0 = arith.constant 0 : i32
    %c0_i32_1 = arith.constant 0 : i32
    return %c0_i32, %c0_i32_0 : i32, i32
  }
  func.func @transform_2(%arg0: i32, %arg1: i32) -> (i32, i32) {
    %c0_i32 = arith.constant 0 : i32
    %c0_i32_0 = arith.constant 0 : i32
    %c0_i32_1 = arith.constant 0 : i32
    return %c0_i32, %c0_i32_0 : i32, i32
  }
  func.func @transform_3(%arg0: i32, %arg1: i32) -> (i32, i32, i32) {
    %c0_i32 = arith.constant 0 : i32
    %c0_i32_0 = arith.constant 0 : i32
    return %arg0, %c0_i32, %arg1 : i32, i32, i32
  }
}

</mosaic_0001>

<bundles_post_ra>
// kernel: cnn_layer_norm.1
= control target key start
LH: loop header
LB: loop body
LE: loop exit
PB: predicated region body
PF: predicated region fallthrough
CT: control target
= control target key end

     0   :  { %8 = vsyncpa [#allocation3], 0  ;;  %s993_s0 = inlined_call_operand.hbm [shape: f32[8,16,16], index: 0, kind: input, shape index: {}]   ;;  %s994_s1 = inlined_call_operand.vmem [shape: f32[16,1], index: 1, kind: input, shape index: {}]   ;;  %s995_s2 = inlined_call_operand.vmem [shape: f32[16,1], index: 2, kind: input, shape index: {}]   ;;  %s996_s3 = inlined_call_operand.hbm [shape: f32[8,16,16], index: 3, kind: output, shape index: {}]  }
   0x1   :  { %10 = vsyncpa [#allocation3 + $0x1], 0 }
   0x2   :  { %11 = vsyncpa [#allocation4], 0 }
   0x3   :  { %13 = vsyncpa [#allocation4 + $0x1], 0  ;;  %s730_s12 = smov 0   ;;  %s732_s13 = smov 0  }
   0x4   :  { %s734_s14 = smov 0   ;;  %s736_s15 = smov 0  }
   0x5   :  { %s738_s16 = smov 0   ;;  %s740_s17 = smov 0  }
   0x6 LB: > { %s491_s18 = sadd.s32 4294967295, %s701_s17   ;;  %s492_s19 = sadd.s32 4294967294, %s701_s17   ;;  %s701_s17 = sphi %s740_s17, %s19_s17   ;;  %s697_s16 = sphi %s738_s16, %s1011_s16   ;;  %s693_s15 = sphi %s736_s15, %s1010_s15   ;;  %s689_s14 = sphi %s734_s14, %s1009_s14   ;;  %s685_s13 = sphi %s732_s13, %s1008_s13   ;;  %s681_s12 = sphi %s730_s12, %s1007_s12  }
   0x7   : > { %s31_s20 = sadd.s32 1, %s697_s16  ;;  %s40_s21 = sadd.s32 1, %s689_s14 }
   0x8   : > { %p33_p0 = scmp.ge.s32.totalorder %s31_s20, 2  ;;  %p47_p1 = scmp.ne.s32.totalorder %s689_s14, %s685_s13 }
   0x9   : > { %p48_p2 = scmp.eq.s32.totalorder %s701_s17, 0  ;;  %p53_p3 = scmp.ne.s32.totalorder %s685_s13, %s681_s12 }
   0xa   : > { %s1013_s20 = smov (%p33_p0, %s31_s20), 0  ;;  %p54_p5 = scmp.eq.s32.totalorder %s491_s18, 0 }
   0xb   : > { %p771_p4 = por %p48_p2, %p47_p1  ;;  %s35_s23 = ssub.s32 %s697_s16, %s1013_s20 }
   0xc   : > { %p121_p6 = scmp.eq.s32.totalorder %s491_s18, 1  ;;  %p38_p7 = scmp.eq.s32.totalorder %s35_s23, 0 }
   0xd   : > { %p777_p8 = por %p54_p5, %p53_p3  ;;  %p127_p10 = scmp.eq.s32.totalorder %s492_s19, 1 }
   0xe   : > { %p781_p9 = por %p121_p6, %p47_p1  ;;  %p524_p13 = scmp.lt.s32.totalorder %s701_s17, 2 }
   0xf   : > { %s786_s26 = scalar_select %p38_p7, %s689_s14, %s40_s21  }
  0x10   : > { %s1000_s25 = scalar_select %p781_p9, 1, 0 }
  0x11   : > { %p788_p11 = por %p127_p10, %p53_p3  ;;  %s153_s28 = sand.u32 1, %s689_s14  }
  0x12   : > { %s495_s29 = sshll.u32 %s153_s28, 6  ;;  %s509_s30 = sshll.u32 %s697_s16, 10 }
  0x13   : > { %s1001_s27 = scalar_select %p788_p11, 1, 0 }
  0x14   : > { %s799_s6 = scalar_lea.hbm %s993_s0, %s509_s30  ;;  %s157_s7 = scalar_lea.vmem [#allocation2], %s495_s29 }
  0x15   : > { %s166_s8 = sshll.u32 %s157_s7, 4  ;;  %p805_p0 = pnand %p524_p13, %p771_p4  ;;  %s801_s8 = int_to_ptr.vmem [resolvable:$true] %s166_s8 }
  0x16   : > { %s810_s10 = scalar_lea.sflag [#allocation3], %s153_s28  ;;  %s589_s11 = scalar_lea.hbm %s799_s6, 1024 }
  0x17   : > { %p590_p2 = scmp.ne.s32.totalorder %s799_s6, %s589_s11  ;;  %p591_p3 = pneg %p805_p0 }
  0x18   : > { %s594_s21 = scalar_lea.hbm %s993_s0, 2048  ;;  %p595_p4 = scmp.lt.u32.totalorder %s799_s6, %s993_s0 }
  0x19   : > { %p592_p5 = pnand %p591_p3, %p590_p2  ;;  %p596_p7 = scmp.lt.u32.totalorder %s594_s21, %s589_s11 }
  0x1a   : > { %p598_p13 = scmp.lt.u32.totalorder %s589_s11, %s799_s6 }
  0x1b   : > { %p593_p6 = pneg %p592_p5  ;;  %p597_p10 = por %p596_p7, %p595_p4 }
  0x1d   : > { %p599_p12 = por %p598_p13, %p597_p10 }
  0x1f   : > { %p600_p1 = pnand %p599_p12, %p593_p6 }
  0x21   : > { %603 = shalt.err (!%p600_p1)
}
  0x22   : > { %s604_s28 = scalar_lea.vmem %s801_s8, 1024  ;;  %s703_s29 = smov [#allocation2]  }
  0x23   : > { %p605_p2 = scmp.ne.s32.totalorder %s801_s8, %s604_s28  ;;  %s609_s30 = sshll.u32 %s703_s29, 4  ;;  %s610_s30 = int_to_ptr.vmem [resolvable:$false] %s609_s30 }
  0x24   : > { %s611_s4 = scalar_lea.vmem %s610_s30, 2048  ;;  %p612_p9 = scmp.lt.s32.totalorder %s801_s8, %s610_s30 }
  0x25   : > { %p607_p5 = pnand %p605_p2, %p591_p3  ;;  %p613_p4 = scmp.lt.s32.totalorder %s611_s4, %s604_s28 }
  0x27   : > { %p608_p11 = pneg %p607_p5  ;;  %p614_p7 = por %p613_p4, %p612_p9 }
  0x29   : > { %p615_p10 = pnand %p614_p7, %p608_p11 }
  0x2b   : > { %618 = shalt.err (!%p615_p10)
}
  0x2c   : > { %s704_s5 = smov 128   ;;  %s705_s7 = smov 8  }
  0x2d   : > { %519 = dma.hbm_to_vmem [thread:$0]  (!%p805_p0), %s799_s6, 1024, %s801_s8, %s810_s10, %s704_s5, %s704_s5, %s705_s7  }
  0x2e   : > { %p174_p12 = scmp.lt.s32.totalorder %s701_s17, 3  ;;  %p1003_p1 = scmp.ge.s32.totalorder %s701_s17, 1 }
  0x30   : > { %p175_p3 = pnand %p1003_p1, %p174_p12 }
  0x31   : > { %s842_s11 = sand.u32 (!%p175_p3), 1, %s685_s13  }
  0x32   : > { %178 = sbr.rel (%p175_p3) target bundleno = 212 (0xd4), region = 32  ;;  %s500_s18 = sshll.u32 (!%p175_p3), %s842_s11, 6 }
  0x33   : > { %s181_s19 = scalar_lea.sflag (!%p175_p3), [#allocation3], %s842_s11  ;;  %s184_s21 = scalar_lea.vmem (!%p175_p3), [#allocation2], %s500_s18 }
  0x39   : > { %672 = dma.done.wait (%p777_p8), %s181_s19, 1024  }
  0x3a   : > { %674 = vsyncadd (%p777_p8), %s181_s19, 4294966272  ;;  %v706_v0 = vmov 0   ;;  %v219_v1 = vld [vmem:[%s995_s2] sm:$0xff]  ;;  %v220_v3 = vld [vmem:[%s995_s2 + $0x8] sm:$0xff]  ;;  %vm221_vm0 = vcmask 130048   ;;  %s511_s29 = sshll.u32 %s693_s15, 10 }
  0x3b   : > { %580 = vset.pattern.permute.xlu1 %v706_v0  ;;  %579 = vset.pattern.permute.xlu0 %v706_v0  ;;  %v217_v2 = vld [vmem:[%s994_s1] sm:$0xff]  ;;  %v218_v4 = vld [vmem:[%s994_s1 + $0x8] sm:$0xff]  ;;  %v872_v9 = vld [vmem:[%s184_s21 + $0x10] sm:$0xff]  ;;  %s206_s30 = scalar_lea.vmem [#allocation5], %s500_s18  ;;  %s938_s7 = scalar_lea.hbm %s996_s3, %s511_s29 }
  0x3c   : > { %366 = vperm.xlu1 %580, %v219_v1   ;;  %348 = vperm.xlu0 %579, %v217_v2   ;;  %v864_v5 = vld [vmem:[%s184_s21] sm:$0xff]  ;;  %v866_v6 = vld [vmem:[%s184_s21 + $0x8] sm:$0xff]  ;;  %v874_v10 = vld [vmem:[%s184_s21 + $0x18] sm:$0xff]  ;;  %v231_v18 = vsel %vm221_vm0, %v872_v9, 0.0  ;;  %v260_v20 = vmul.f32 %v872_v9, %v872_v9  ;;  %s406_s4 = sshll.u32 %s206_s30, 4  ;;  %s391_s18 = scalar_lea.sflag [#allocation4], %s842_s11  ;;  %s940_s4 = int_to_ptr.vmem [resolvable:$true] %s406_s4 }
  0x3d   : > { %v222_v7 = vsel %vm221_vm0, %v864_v5, 0.0  ;;  %v223_v8 = vsel %vm221_vm0, %v866_v6, 0.0  ;;  %v876_v11 = vld [vmem:[%s184_s21 + $0x20] sm:$0xff]  ;;  %v878_v12 = vld [vmem:[%s184_s21 + $0x28] sm:$0xff]  ;;  %v880_v13 = vld [vmem:[%s184_s21 + $0x30] sm:$0xff]  ;;  %v258_v16 = vmul.f32 %v864_v5, %v864_v5  ;;  %v259_v17 = vmul.f32 %v866_v6, %v866_v6  ;;  %s619_s19 = scalar_lea.vmem %s940_s4, 1024 }
  0x3e   : > { %v882_v14 = vld [vmem:[%s184_s21 + $0x38] sm:$0xff]  ;;  %v224_v15 = vadd.f32 %v223_v8, %v222_v7  ;;  %v232_v19 = vsel %vm221_vm0, %v874_v10, 0.0  ;;  %v261_v21 = vmul.f32 %v874_v10, %v874_v10  ;;  %v240_v22 = vsel %vm221_vm0, %v876_v11, 0.0  ;;  %p620_p8 = scmp.ne.s32.totalorder %s940_s4, %s619_s19  ;;  %p1004_p9 = scmp.ne.s32.totalorder %s1000_s25, 0 }
  0x3f   : > { %v241_v23 = vsel %vm221_vm0, %v878_v12, 0.0  ;;  %v262_v24 = vmul.f32 %v876_v11, %v876_v11  ;;  %v263_v25 = vmul.f32 %v878_v12, %v878_v12  ;;  %v249_v26 = vsel %vm221_vm0, %v880_v13, 0.0  ;;  %s707_s21 = smov [#allocation5]  }
  0x40   : > { %371 = vperm.xlu1 %580, %v220_v3   ;;  %353 = vperm.xlu0 %579, %v218_v4   ;;  %v250_v27 = vsel %vm221_vm0, %v882_v14, 0.0  ;;  %v264_v28 = vmul.f32 %v880_v13, %v880_v13  ;;  %v265_v29 = vmul.f32 %v882_v14, %v882_v14  ;;  %v233_v30 = vadd.f32 %v232_v19, %v231_v18  ;;  %p621_p11 = pnand %p620_p8, %p1004_p9  ;;  %s623_s6 = sshll.u32 %s707_s21, 4  ;;  %s624_s6 = int_to_ptr.vmem [resolvable:$false] %s623_s6 }
  0x41   : > { %v266_v31 = vsel %vm221_vm0, %v258_v16, 0.0  ;;  %v267_v32 = vsel %vm221_vm0, %v259_v17, 0.0  ;;  %v242_v33 = vadd.f32 %v241_v23, %v240_v22  ;;  %v275_v34 = vsel %vm221_vm0, %v260_v20, 0.0  ;;  %s625_s8 = scalar_lea.vmem %s624_s6, 2048  ;;  %p626_p6 = scmp.lt.s32.totalorder %s940_s4, %s624_s6 }
  0x42   : > { %v276_v35 = vsel %vm221_vm0, %v261_v21, 0.0  ;;  %v251_v36 = vadd.f32 %v250_v27, %v249_v26  ;;  %v284_v37 = vsel %vm221_vm0, %v262_v24, 0.0  ;;  %v285_v38 = vsel %vm221_vm0, %v263_v25, 0.0  ;;  %p622_p0 = pneg %p621_p11  ;;  %p627_p13 = scmp.lt.s32.totalorder %s625_s8, %s619_s19 }
  0x43   : > { %v225_v39 = vrot.slane %v224_v15, 4  ;;  %v268_v40 = vadd.f32 %v267_v32, %v266_v31  ;;  %v293_v41 = vsel %vm221_vm0, %v264_v28, 0.0  ;;  %v294_v42 = vsel %vm221_vm0, %v265_v29, 0.0 }
  0x44   : > { %v234_v43 = vrot.slane %v233_v30, 4  ;;  %v277_v44 = vadd.f32 %v276_v35, %v275_v34  ;;  %v243_v45 = vrot.slane %v242_v33, 4  ;;  %v286_v46 = vadd.f32 %v285_v38, %v284_v37  ;;  %p628_p2 = por %p627_p13, %p626_p6 }
  0x45   : > { %v252_v47 = vrot.slane %v251_v36, 4  ;;  %v295_v48 = vadd.f32 %v294_v42, %v293_v41  ;;  %v226_v49 = vadd.f32 %v225_v39, %v224_v15  ;;  %v269_v50 = vrot.slane %v268_v40, 4 }
  0x46   : > { %v235_v51 = vadd.f32 %v234_v43, %v233_v30  ;;  %v278_v52 = vrot.slane %v277_v44, 4  ;;  %v244_v53 = vadd.f32 %v243_v45, %v242_v33  ;;  %v287_v54 = vrot.slane %v286_v46, 4  ;;  %p629_p5 = pnand %p628_p2, %p622_p0 }
  0x47   : > { %v253_v55 = vadd.f32 %v252_v47, %v251_v36  ;;  %v296_v56 = vrot.slane %v295_v48, 4  ;;  %v227_v57 = vrot.slane %v226_v49, 2  ;;  %v270_v58 = vadd.f32 %v269_v50, %v268_v40 }
  0x48   : > { %v236_v59 = vrot.slane %v235_v51, 2  ;;  %v279_v60 = vadd.f32 %v278_v52, %v277_v44  ;;  %v245_v61 = vrot.slane %v244_v53, 2  ;;  %v288_v62 = vadd.f32 %v287_v54, %v286_v46 }
  0x49   : > { %v254_v63 = vrot.slane %v253_v55, 2  ;;  %v297_v0 = vadd.f32 %v296_v56, %v295_v48  ;;  %v228_v1 = vadd.f32 %v227_v57, %v226_v49  ;;  %v271_v2 = vrot.slane %v270_v58, 2 }
  0x4a   : > { %v237_v3 = vadd.f32 %v236_v59, %v235_v51  ;;  %v280_v4 = vrot.slane %v279_v60, 2  ;;  %v246_v7 = vadd.f32 %v245_v61, %v244_v53  ;;  %v289_v8 = vrot.slane %v288_v62, 2 }
  0x4b   : > { %v255_v15 = vadd.f32 %v254_v63, %v253_v55  ;;  %v298_v16 = vrot.slane %v297_v0, 2  ;;  %v229_v17 = vrot.slane %v228_v1, 1  ;;  %v272_v18 = vadd.f32 %v271_v2, %v270_v58 }
  0x4c   : > { %v238_v19 = vrot.slane %v237_v3, 1  ;;  %v281_v20 = vadd.f32 %v280_v4, %v279_v60  ;;  %v247_v21 = vrot.slane %v246_v7, 1  ;;  %v290_v22 = vadd.f32 %v289_v8, %v288_v62 }
  0x4d   : > { %v256_v23 = vrot.slane %v255_v15, 1  ;;  %v299_v24 = vadd.f32 %v298_v16, %v297_v0  ;;  %v230_v25 = vadd.f32 %v229_v17, %v228_v1  ;;  %v273_v26 = vrot.slane %v272_v18, 1 }
  0x4e   : > { %v239_v27 = vadd.f32 %v238_v19, %v237_v3  ;;  %v282_v28 = vrot.slane %v281_v20, 1  ;;  %v248_v29 = vadd.f32 %v247_v21, %v246_v7  ;;  %v291_v30 = vrot.slane %v290_v22, 1 }
  0x4f   : > { %v257_v31 = vadd.f32 %v256_v23, %v255_v15  ;;  %v300_v32 = vrot.slane %v299_v24, 1  ;;  %v274_v33 = vadd.f32 %v273_v26, %v272_v18  ;;  %v302_v34 = vmul.f32 0.0625, %v230_v25 }
  0x50   : > { %v283_v35 = vadd.f32 %v282_v28, %v281_v20  ;;  %v303_v36 = vmul.f32 0.0625, %v239_v27  ;;  %v292_v37 = vadd.f32 %v291_v30, %v290_v22  ;;  %v304_v38 = vmul.f32 0.0625, %v248_v29 }
  0x51   : > { %v301_v39 = vadd.f32 %v300_v32, %v299_v24  ;;  %v305_v40 = vmul.f32 0.0625, %v257_v31  ;;  %v306_v41 = vmul.f32 0.0625, %v274_v33  ;;  %v310_v42 = vmul.f32 %v302_v34, %v302_v34 }
  0x52   : > { %v307_v43 = vmul.f32 0.0625, %v283_v35  ;;  %v311_v44 = vmul.f32 %v303_v36, %v303_v36  ;;  %v308_v45 = vmul.f32 0.0625, %v292_v37  ;;  %v312_v46 = vmul.f32 %v304_v38, %v304_v38 }
  0x53   : > { %v309_v47 = vmul.f32 0.0625, %v301_v39  ;;  %v313_v48 = vmul.f32 %v305_v40, %v305_v40  ;;  %v314_v49 = vsub.f32 %v306_v41, %v310_v42  ;;  %v330_v0 = vsub.f32 %v864_v5, %v302_v34 }
  0x54   : > { %v315_v50 = vsub.f32 %v307_v43, %v311_v44  ;;  %v316_v51 = vsub.f32 %v308_v45, %v312_v46  ;;  %v332_v1 = vsub.f32 %v872_v9, %v303_v36  ;;  %v334_v2 = vsub.f32 %v876_v11, %v304_v38 }
  0x55   : > { %v317_v52 = vsub.f32 %v309_v47, %v313_v48  ;;  %v318_v53 = vmax.f32 %v314_v49, 0.0  ;;  %v336_v3 = vsub.f32 %v880_v13, %v305_v40  ;;  %v331_v7 = vsub.f32 %v866_v6, %v302_v34 }
  0x56   : > { %v319_v54 = vmax.f32 %v315_v50, 0.0  ;;  %v320_v55 = vmax.f32 %v316_v51, 0.0  ;;  %v333_v8 = vsub.f32 %v874_v10, %v303_v36  ;;  %v335_v15 = vsub.f32 %v878_v12, %v304_v38 }
  0x57   : > { %v321_v56 = vmax.f32 %v317_v52, 0.0  ;;  %v322_v57 = vadd.f32 1e-05, %v318_v53  ;;  %v337_v16 = vsub.f32 %v882_v14, %v305_v40 }
  0x58   : > { %v323_v58 = vadd.f32 1e-05, %v319_v54  ;;  %v324_v59 = vadd.f32 1e-05, %v320_v55 }
  0x59   : > { %v325_v60 = vadd.f32 1e-05, %v321_v56  ;;  %581 = vrsqrt.f32 %v322_v57 }
  0x5a   : > { %583 = vrsqrt.f32 %v323_v58 }
  0x5b   : > { %585 = vrsqrt.f32 %v324_v59 }
  0x5c   : > { %587 = vrsqrt.f32 %v325_v60 }
  0x63   : > { %v582_v61 = vpop.eup %581 }
  0x64   : > { %v584_v62 = vpop.eup %583  ;;  %v338_v17 = vmul.f32 %v582_v61, %v330_v0  ;;  %v339_v11 = vmul.f32 %v582_v61, %v331_v7 }
  0x65   : > { %v586_v63 = vpop.eup %585  ;;  %v340_v18 = vmul.f32 %v584_v62, %v332_v1  ;;  %v341_v21 = vmul.f32 %v584_v62, %v333_v8 }
  0x66   : > { %v588_v4 = vpop.eup %587  ;;  %v342_v19 = vmul.f32 %v586_v63, %v334_v2  ;;  %v343_v13 = vmul.f32 %v586_v63, %v335_v15 }
  0x67   : > { %v344_v5 = vmul.f32 %v588_v4, %v336_v3  ;;  %v345_v22 = vmul.f32 %v588_v4, %v337_v16 }
  0xbb   : > { %v367_v9 = vpop.permute.xlu1 %366  ;;  %v349_v20 = vpop.permute.xlu0 %348 }
  0xbc   : > { %v356_v23 = vmul.f32 %v349_v20, %v338_v17  ;;  %v358_v6 = vmul.f32 %v349_v20, %v340_v18  ;;  %v360_v24 = vmul.f32 %v349_v20, %v342_v19  ;;  %v362_v10 = vmul.f32 %v349_v20, %v344_v5 }
  0xbe   : > { %v374_v25 = vadd.f32 %v367_v9, %v356_v23  ;;  %v376_v12 = vadd.f32 %v367_v9, %v358_v6  ;;  %v378_v26 = vadd.f32 %v367_v9, %v360_v24  ;;  %v380_v14 = vadd.f32 %v367_v9, %v362_v10 }
  0xbf   : > { %v354_v27 = vpop.permute.xlu0 %353  ;;  %v372_v32 = vpop.permute.xlu1 %371 }
  0xc0   : > { %382 = vst.msk [vmem:[%s206_s30] sm:$0xff] %vm221_vm0, %v374_v25  ;;  %384 = vst.msk [vmem:[%s206_s30 + $0x10] sm:$0xff] %vm221_vm0, %v376_v12  ;;  %v357_v28 = vmul.f32 %v354_v27, %v339_v11  ;;  %v359_v29 = vmul.f32 %v354_v27, %v341_v21  ;;  %v361_v30 = vmul.f32 %v354_v27, %v343_v13 }
  0xc1   : > { %386 = vst.msk [vmem:[%s206_s30 + $0x20] sm:$0xff] %vm221_vm0, %v378_v26  ;;  %388 = vst.msk [vmem:[%s206_s30 + $0x30] sm:$0xff] %vm221_vm0, %v380_v14  ;;  %v363_v31 = vmul.f32 %v354_v27, %v345_v22 }
  0xc2   : > { %v375_v33 = vadd.f32 %v372_v32, %v357_v28  ;;  %v377_v34 = vadd.f32 %v372_v32, %v359_v29  ;;  %v379_v35 = vadd.f32 %v372_v32, %v361_v30 }
  0xc3   : > { %v381_v36 = vadd.f32 %v372_v32, %v363_v31 }
  0xc4   : > { %383 = vst.msk [vmem:[%s206_s30 + $0x8] sm:$0xff] %vm221_vm0, %v375_v33  ;;  %385 = vst.msk [vmem:[%s206_s30 + $0x18] sm:$0xff] %vm221_vm0, %v377_v34 }
  0xc5   : > { %387 = vst.msk [vmem:[%s206_s30 + $0x28] sm:$0xff] %vm221_vm0, %v379_v35  ;;  %389 = vst.msk [vmem:[%s206_s30 + $0x38] sm:$0xff] %vm221_vm0, %v381_v36 }
  0xc6   : > { %632 = shalt.err (!%p629_p5)
}
  0xc7   : > { %s633_s9 = scalar_lea.hbm %s938_s7, 1024  ;;  %s637_s23 = scalar_lea.hbm %s996_s3, 2048 }
  0xc8   : > { %p634_p4 = scmp.ne.s32.totalorder %s938_s7, %s633_s9  ;;  %p638_p12 = scmp.lt.u32.totalorder %s938_s7, %s996_s3 }
  0xc9   : > { %p639_p1 = scmp.lt.u32.totalorder %s637_s23, %s633_s9  ;;  %p641_p8 = scmp.lt.u32.totalorder %s633_s9, %s938_s7 }
  0xca   : > { %p635_p7 = pnand %p634_p4, %p1004_p9 }
  0xcb   : > { %p640_p3 = por %p639_p1, %p638_p12 }
  0xcc   : > { %p636_p10 = pneg %p635_p7 }
  0xcd   : > { %p642_p11 = por %p641_p8, %p640_p3 }
  0xcf   : > { %p643_p0 = pnand %p642_p11, %p636_p10 }
  0xd1   : > { %646 = shalt.err (!%p643_p0)
}
  0xd2   : > { %s708_s29 = smov 128   ;;  %s709_s30 = smov 8  }
  0xd3   : > { %514 = dma.vmem_to_hbm [thread:$0]  (%p1004_p9), %s940_s4, 1024, %s938_s7, %s391_s18, %s708_s29, %s708_s29, %s709_s30  }
  0xd4 PF: > { %s421_s15 = sand.u32 1, %s681_s12   ;;  %p1005_p6 = scmp.ne.s32.totalorder %s1001_s27, 0 }
  0xd5   : > { %p1006_p13 = scmp.ge.s32.totalorder %s701_s17, 2  ;;  %s422_s5 = scalar_lea.sflag [#allocation4], %s421_s15 }
  0xd7   : > { %p521_p2 = pnand %p1006_p13, %p1005_p6 }
  0xd9   : > { %676 = dma.done.wait (!%p521_p2), %s422_s5, 1024  }
  0xda   : > { %678 = vsyncadd (!%p521_p2), %s422_s5, 4294966272  ;;  %s19_s17 = sadd.s32 1, %s701_s17   ;;  %s1007_s12 = smov %s685_s13 }
  0xdb   : > { %p16_p5 = scmp.ge.s32.totalorder %s19_s17, 4   ;;  %s1008_s13 = smov %s689_s14 }
  0xdc   : > { %s1009_s14 = smov %s786_s26  ;;  %s1010_s15 = smov %s697_s16 }
  0xdd   : > { %s1011_s16 = smov %s1013_s20  ;;  %18 = sbr.rel (!%p16_p5) target bundleno = 6 (0x6), region = 77 }
  0xe4   :  { %427 = vsyncpa [#allocation3], 1 }
  0xe5   :  { %429 = vsyncpa [#allocation3 + $0x1], 1 }
  0xe6   :  { %430 = vsyncpa [#allocation4], 1 }
  0xe7   :  { %432 = vsyncpa [#allocation4 + $0x1], 1 }

</bundles_post_ra>
